<compile_context>
chip_gen: v6e
topology: v6e:2x2x1
jax: 0.10.0
libtpu: 0.0.40
codegen_flags: <defaults>
</compile_context>

<pallas_src>
import jax
import jax.numpy as jnp
from jax import lax
from jax.experimental import pallas as pl
from jax.experimental.pallas import tpu as pltpu


def _round_up(x, m):
    return ((x + m - 1) // m) * m


def _single_tile_kernel(x0_ref, x1_ref, batch_ref, w_ref, b_ref, out_ref):
    """All nodes fit in one VMEM tile: fused pool + concat-linear, no scratch."""
    B, F0 = x0_ref.shape
    N, F1 = x1_ref.shape

    node_graph = batch_ref[...]                                   # [1, N] int32
    graph_ids = lax.broadcasted_iota(jnp.int32, (B, N), 0)        # [B, N]
    one_hot = (graph_ids == node_graph).astype(jnp.float32)       # [B, N]

    sums = jnp.dot(one_hot, x1_ref[...],
                   preferred_element_type=jnp.float32)            # [B, F1] (MXU)
    counts = jnp.sum(one_hot, axis=1, keepdims=True)              # [B, 1]  (XLU)
    pooled = sums * pl.reciprocal(jnp.maximum(counts, 1.0), approx=False)

    # two sublane-aligned dots instead of an unaligned concat store
    acc = jnp.dot(x0_ref[...], w_ref[:F0, :],
                  preferred_element_type=jnp.float32)
    acc += jnp.dot(pooled, w_ref[F0:, :],
                   preferred_element_type=jnp.float32)
    out_ref[...] = (acc + b_ref[...]).astype(out_ref.dtype)


def _make_tiled_kernel(n_valid, node_tile):
    """Streaming kernel for large N: node axis is the (last, 'arbitrary') grid
    axis; segment sums + counts accumulate in VMEM scratch; the ragged last
    tile is masked in-kernel (no HBM padding of x1/batch)."""

    def kernel(x0_ref, x1_ref, batch_ref, w_ref, b_ref, out_ref,
               sums_ref, cnt_ref):
        B, F0 = x0_ref.shape
        tn, F1 = x1_ref.shape
        k = pl.program_id(0)

        @pl.when(k == 0)
        def _init():
            sums_ref[...] = jnp.zeros_like(sums_ref)
            cnt_ref[...] = jnp.zeros_like(cnt_ref)

        # validity masks for the ragged tail (OOB block data is garbage)
        col = k * node_tile + lax.broadcasted_iota(jnp.int32, (1, tn), 1)
        valid_col = col < n_valid                                  # [1, tn]
        row = k * node_tile + lax.broadcasted_iota(jnp.int32, (tn, 1), 0)
        x1 = jnp.where(row < n_valid, x1_ref[...], 0.0)            # [tn, F1]

        node_graph = batch_ref[...]                                # [1, tn] int32
        graph_ids = lax.broadcasted_iota(jnp.int32, (B, tn), 0)    # [B, tn]
        one_hot = jnp.where(valid_col & (graph_ids == node_graph), 1.0, 0.0)

        sums_ref[...] += jnp.dot(one_hot, x1,
                                 preferred_element_type=jnp.float32)   # [B, F1]
        cnt_ref[...] += jnp.sum(one_hot, axis=1, keepdims=True)         # [B, 1]

        @pl.when(k == pl.num_programs(0) - 1)
        def _finalize():
            pooled = sums_ref[...] * pl.reciprocal(
                jnp.maximum(cnt_ref[...], 1.0), approx=False)
            acc = jnp.dot(x0_ref[...], w_ref[:F0, :],
                          preferred_element_type=jnp.float32)
            acc += jnp.dot(pooled, w_ref[F0:, :],
                           preferred_element_type=jnp.float32)
            out_ref[...] = (acc + b_ref[...]).astype(out_ref.dtype)

    return kernel


def make_tox21_concat_linear(weight, bias, *, node_tile=2048):
    """Factory: pads parameters once (lane-dense output columns) and returns a
    jitted apply(x0, x1, batch) -> [B, out].

    weight: [F0+F1, out] f32 (PyTorch weight transposed), bias: [out] f32.
    node_tile must be a multiple of 128 (used only when N > node_tile)."""
    f_in, out_features = weight.shape
    LANE = 128
    out_pad = _round_up(out_features, LANE)
    assert node_tile % LANE == 0

    # one-time, hoisted parameter padding (zeros in the padded output columns)
    w_p = jnp.zeros((f_in, out_pad), jnp.float32).at[:, :out_features].set(
        weight.astype(jnp.float32))
    b_p = jnp.zeros((1, out_pad), jnp.float32).at[0, :out_features].set(
        bias.astype(jnp.float32))

    @jax.jit
    def apply(x0, x1, batch):
        B, F0 = x0.shape
        N, F1 = x1.shape
        assert F0 + F1 == f_in
        x0f = x0.astype(jnp.float32)
        x1f = x1.astype(jnp.float32)
        batch_2d = batch.astype(jnp.int32).reshape(1, N)

        if N <= node_tile:
            # single grid step: full-array blocks, no scratch, no masking
            out_padded = pl.pallas_call(
                _single_tile_kernel,
                out_shape=jax.ShapeDtypeStruct((B, out_pad), jnp.float32),
                grid=(1,),
                in_specs=[
                    pl.BlockSpec((B, F0), lambda k: (0, 0)),        # x0
                    pl.BlockSpec((N, F1), lambda k: (0, 0)),        # x1 (all nodes)
                    pl.BlockSpec((1, N), lambda k: (0, 0)),         # batch ids
                    pl.BlockSpec((f_in, out_pad), lambda k: (0, 0)),  # W
                    pl.BlockSpec((1, out_pad), lambda k: (0, 0)),     # bias
                ],
                out_specs=pl.BlockSpec((B, out_pad), lambda k: (0, 0)),
                compiler_params=pltpu.CompilerParams(
                    dimension_semantics=("arbitrary",)),
            )(x0f, x1f, batch_2d, w_p, b_p)
        else:
            n_tiles = pl.cdiv(N, node_tile)
            kernel = _make_tiled_kernel(N, node_tile)
            out_padded = pl.pallas_call(
                kernel,
                out_shape=jax.ShapeDtypeStruct((B, out_pad), jnp.float32),
                grid=(n_tiles,),
                in_specs=[
                    pl.BlockSpec((B, F0), lambda k: (0, 0)),          # x0 (resident)
                    pl.BlockSpec((node_tile, F1), lambda k: (k, 0)),  # x1 tile
                    pl.BlockSpec((1, node_tile), lambda k: (0, k)),   # batch tile
                    pl.BlockSpec((f_in, out_pad), lambda k: (0, 0)),  # W (resident)
                    pl.BlockSpec((1, out_pad), lambda k: (0, 0)),     # bias
                ],
                out_specs=pl.BlockSpec((B, out_pad), lambda k: (0, 0)),
                scratch_shapes=[
                    pltpu.VMEM((B, F1), jnp.float32),   # segment sums
                    pltpu.VMEM((B, 1), jnp.float32),    # per-graph counts
                ],
                compiler_params=pltpu.CompilerParams(
                    dimension_semantics=("arbitrary",)),  # node axis = reduction
            )(x0f, x1f, batch_2d, w_p, b_p)

        return out_padded[:, :out_features]

    return apply


def _reference(x0, x1, batch, weight, bias):
    B = x0.shape[0]
    one_hot = (jnp.arange(B)[:, None] == batch[None, :]).astype(jnp.float32)
    pooled = (one_hot @ x1) / jnp.maximum(one_hot.sum(1, keepdims=True), 1.0)
    return jnp.concatenate([x0, pooled], axis=1) @ weight + bias[None, :]


if __name__ == "__main__":
    key = jax.random.PRNGKey(0)
    B, N, F0, F1, OUT = 4, 300, 32, 32, 16

    k0, k1, kw, kb, kn = jax.random.split(key, 5)
    x0 = jax.random.normal(k0, (B, F0), dtype=jnp.float32)        # graph-level value
    x1 = jax.random.normal(k1, (N, F1), dtype=jnp.float32)        # node-level value
    # sorted node -> graph assignment (PyG convention), every graph non-empty
    batch = jnp.sort(jnp.concatenate([
        jnp.arange(B, dtype=jnp.int32),
        jax.random.randint(kn, (N - B,), 0, B, dtype=jnp.int32)]))

    # Deterministic synthetic parameters (exnn.Linear(out_channels) with
    # in_features inferred as F0+F1); weight stored as [in, out].
    weight = (jax.random.normal(kw, (F0 + F1, OUT), dtype=jnp.float32)
              / jnp.sqrt(jnp.float32(F0 + F1)))
    bias = jax.random.normal(kb, (OUT,), dtype=jnp.float32) * 0.01

    y_ref = _reference(x0, x1, batch, weight, bias)

    # Fast path: N <= node_tile -> single grid step, no accumulator scratch.
    apply_fused = make_tox21_concat_linear(weight, bias, node_tile=2048)
    y = jax.block_until_ready(apply_fused(x0, x1, batch))
    assert y.shape == (B, OUT)
    assert jnp.allclose(y, y_ref, atol=1e-4, rtol=1e-4), "fused path mismatch"

    # Streaming path: 128-node tiles (ragged last tile masked in-kernel);
    # exercises the accumulating kernel used for large N.
    apply_tiled = make_tox21_concat_linear(weight, bias, node_tile=128)
    y2 = jax.block_until_ready(apply_tiled(x0, x1, batch))
    assert jnp.allclose(y2, y_ref, atol=1e-4, rtol=1e-4), "tiled path mismatch"

    print("KERNEL_OK")
</pallas_src>

<mosaic_0001>
module attributes {stable_mosaic.version = 11 : i64} {
  func.func @_single_tile_kernel(%arg0: i32, %arg1: memref<4x32xf32, #tpu.memory_space<vmem>>, %arg2: memref<300x32xf32, #tpu.memory_space<vmem>>, %arg3: memref<1x300xi32, #tpu.memory_space<vmem>>, %arg4: memref<64x128xf32, #tpu.memory_space<vmem>>, %arg5: memref<1x128xf32, #tpu.memory_space<vmem>>, %arg6: memref<4x128xf32, #tpu.memory_space<vmem>>) attributes {dimension_semantics = [#tpu.dimension_semantics<arbitrary>], iteration_bounds = array<i64: 1>, scalar_prefetch = 0 : i64, scratch_operands = 0 : i64, tpu.core_type = #tpu.core_type<tc>, window_params = [{pipeline_mode = #tpu.pipeline_mode<synchronous>, transform_indices = @transform_0, window_bounds = array<i64: 4, 32>}, {pipeline_mode = #tpu.pipeline_mode<synchronous>, transform_indices = @transform_1, window_bounds = array<i64: 300, 32>}, {pipeline_mode = #tpu.pipeline_mode<synchronous>, transform_indices = @transform_2, window_bounds = array<i64: 1, 300>}, {pipeline_mode = #tpu.pipeline_mode<synchronous>, transform_indices = @transform_3, window_bounds = array<i64: 64, 128>}, {pipeline_mode = #tpu.pipeline_mode<synchronous>, transform_indices = @transform_4, window_bounds = array<i64: 1, 128>}, {pipeline_mode = #tpu.pipeline_mode<synchronous>, transform_indices = @transform_5, window_bounds = array<i64: 4, 128>}]} {
    %c0 = arith.constant 0 : index
    %c0_0 = arith.constant 0 : index
    %0 = vector.load %arg3[%c0, %c0_0] : memref<1x300xi32, #tpu.memory_space<vmem>>, vector<1x300xi32>
    %1 = tpu.iota {dimensions = array<i32: 0>} : vector<4x300xi32>
    %2 = vector.broadcast %0 : vector<1x300xi32> to vector<4x300xi32>
    %3 = arith.cmpi eq, %1, %2 : vector<4x300xi32>
    %4 = arith.extui %3 : vector<4x300xi1> to vector<4x300xi32>
    %5 = arith.sitofp %4 : vector<4x300xi32> to vector<4x300xf32>
    %c0_1 = arith.constant 0 : index
    %c0_2 = arith.constant 0 : index
    %6 = vector.load %arg2[%c0_1, %c0_2] : memref<300x32xf32, #tpu.memory_space<vmem>>, vector<300x32xf32>
    %cst = arith.constant dense<0.000000e+00> : vector<4x32xf32>
    %7 = tpu.matmul %5, %6, %cst {dimension_numbers = #tpu.dot_dimension_numbers<[1], [0], [0], [1], [0, 0, 1, 1], [], []>} : vector<4x300xf32>, vector<300x32xf32>, vector<4x32xf32> -> vector<4x32xf32>
    %cst_3 = arith.constant dense<0.000000e+00> : vector<4xf32>
    %8 = vector.multi_reduction <add>, %5, %cst_3 [1] : vector<4x300xf32> to vector<4xf32>
    %9 = vector.shape_cast %8 : vector<4xf32> to vector<4x1xf32>
    %cst_4 = arith.constant 1.000000e+00 : f32
    %10 = vector.broadcast %cst_4 : f32 to vector<4x1xf32>
    %11 = arith.maximumf %9, %10 : vector<4x1xf32>
    %12 = tpu.reciprocal %11 : vector<4x1xf32> -> vector<4x1xf32>
    %13 = vector.broadcast %12 : vector<4x1xf32> to vector<4x32xf32>
    %14 = arith.mulf %7, %13 : vector<4x32xf32>
    %c0_5 = arith.constant 0 : index
    %c0_6 = arith.constant 0 : index
    %15 = vector.load %arg1[%c0_5, %c0_6] : memref<4x32xf32, #tpu.memory_space<vmem>>, vector<4x32xf32>
    %c0_7 = arith.constant 0 : index
    %c0_8 = arith.constant 0 : index
    %16 = vector.load %arg4[%c0_7, %c0_8] : memref<64x128xf32, #tpu.memory_space<vmem>>, vector<32x128xf32>
    %cst_9 = arith.constant dense<0.000000e+00> : vector<4x128xf32>
    %17 = tpu.matmul %15, %16, %cst_9 {dimension_numbers = #tpu.dot_dimension_numbers<[1], [0], [0], [1], [0, 0, 1, 1], [], []>} : vector<4x32xf32>, vector<32x128xf32>, vector<4x128xf32> -> vector<4x128xf32>
    %c32 = arith.constant 32 : index
    %c0_10 = arith.constant 0 : index
    %18 = vector.load %arg4[%c32, %c0_10] : memref<64x128xf32, #tpu.memory_space<vmem>>, vector<32x128xf32>
    %cst_11 = arith.constant dense<0.000000e+00> : vector<4x128xf32>
    %19 = tpu.matmul %14, %18, %cst_11 {dimension_numbers = #tpu.dot_dimension_numbers<[1], [0], [0], [1], [0, 0, 1, 1], [], []>} : vector<4x32xf32>, vector<32x128xf32>, vector<4x128xf32> -> vector<4x128xf32>
    %20 = arith.addf %17, %19 : vector<4x128xf32>
    %c0_12 = arith.constant 0 : index
    %c0_13 = arith.constant 0 : index
    %21 = vector.load %arg5[%c0_12, %c0_13] : memref<1x128xf32, #tpu.memory_space<vmem>>, vector<1x128xf32>
    %22 = vector.broadcast %21 : vector<1x128xf32> to vector<4x128xf32>
    %23 = arith.addf %20, %22 : vector<4x128xf32>
    %c0_14 = arith.constant 0 : index
    %c0_15 = arith.constant 0 : index
    %24 = vector.load %arg6[%c0_14, %c0_15] : memref<4x128xf32, #tpu.memory_space<vmem>>, vector<4x128xf32>
    tpu.vector_store %arg6[%c0_14, %c0_15], %23 {strides = array<i32>} : memref<4x128xf32, #tpu.memory_space<vmem>>, vector<4x128xf32>,
    return
  }
  func.func @transform_0(%arg0: i32) -> (i32, i32) {
    %c0_i32 = arith.constant 0 : i32
    %c0_i32_0 = arith.constant 0 : i32
    %c0_i32_1 = arith.constant 0 : i32
    return %c0_i32, %c0_i32_0 : i32, i32
  }
  func.func @transform_1(%arg0: i32) -> (i32, i32) {
    %c0_i32 = arith.constant 0 : i32
    %c0_i32_0 = arith.constant 0 : i32
    %c0_i32_1 = arith.constant 0 : i32
    return %c0_i32, %c0_i32_0 : i32, i32
  }
  func.func @transform_2(%arg0: i32) -> (i32, i32) {
    %c0_i32 = arith.constant 0 : i32
    %c0_i32_0 = arith.constant 0 : i32
    %c0_i32_1 = arith.constant 0 : i32
    return %c0_i32, %c0_i32_0 : i32, i32
  }
  func.func @transform_3(%arg0: i32) -> (i32, i32) {
    %c0_i32 = arith.constant 0 : i32
    %c0_i32_0 = arith.constant 0 : i32
    %c0_i32_1 = arith.constant 0 : i32
    return %c0_i32, %c0_i32_0 : i32, i32
  }
  func.func @transform_4(%arg0: i32) -> (i32, i32) {
    %c0_i32 = arith.constant 0 : i32
    %c0_i32_0 = arith.constant 0 : i32
    %c0_i32_1 = arith.constant 0 : i32
    return %c0_i32, %c0_i32_0 : i32, i32
  }
  func.func @transform_5(%arg0: i32) -> (i32, i32) {
    %c0_i32 = arith.constant 0 : i32
    %c0_i32_0 = arith.constant 0 : i32
    %c0_i32_1 = arith.constant 0 : i32
    return %c0_i32, %c0_i32_0 : i32, i32
  }
}

</mosaic_0001>

<bundles_post_ra>
// kernel: apply.1
= control target key start
LH: loop header
LB: loop body
LE: loop exit
PB: predicated region body
PF: predicated region fallthrough
CT: control target
= control target key end

     0   :  { %v548_v4 = vmov 0.0   ;;  %v22_v5 = vlaneseq  ;;  %vm549_vm0 = vmmov 0   ;;  %vm87_vm1 = vcmask 1043456   ;;  %s778_s0 = inlined_call_operand.vmem [shape: f32[4,32], index: 0, kind: input, shape index: {}]   ;;  %s779_s1 = inlined_call_operand.vmem [shape: f32[300,32], index: 1, kind: input, shape index: {}]   ;;  %s780_s2 = inlined_call_operand.vmem [shape: s32[1,300], index: 2, kind: input, shape index: {}]   ;;  %s781_s3 = inlined_call_operand.vmem [shape: f32[64,128], index: 3, kind: input, shape index: {}]   ;;  %s782_s4 = inlined_call_operand.vmem [shape: f32[1,128], index: 4, kind: input, shape index: {}]   ;;  %s783_s5 = inlined_call_operand.hbm [shape: f32[4,128], index: 5, kind: output, shape index: {}]  }
   0x1   :  { %v76_v0 = vld [vmem:[%s779_s1 + $0xf8] sm:$0xff]  ;;  %v75_v2 = vld [vmem:[%s779_s1 + $0xf0] sm:$0xff]  ;;  %483 = vmatprep.subr.mxu1 %v548_v4  ;;  %v74_v6 = vld [vmem:[%s779_s1 + $0xe8] sm:$0xff]  ;;  %495 = vmatprep.mubr.msk.f32.mxu1 %vm549_vm0, %v548_v4 }
   0x2   :  { %v60_v1 = vld [vmem:[%s779_s1 + $0x78] sm:$0xff]  ;;  %431 = vmatprep.subr.mxu0 %v76_v0  ;;  %v59_v3 = vld [vmem:[%s779_s1 + $0x70] sm:$0xff]  ;;  %v58_v7 = vld [vmem:[%s779_s1 + $0x68] sm:$0xff]  ;;  %v609_v10 = vshrl.u32 %v22_v5, 7 }
   0x3   :  { %432 = vmatpush3.msra.mxu0 %v60_v1  ;;  %v73_v8 = vld [vmem:[%s779_s1 + $0xe0] sm:$0xff]  ;;  %v72_v11 = vld [vmem:[%s779_s1 + $0xd8] sm:$0xff]  ;;  %v71_v13 = vld [vmem:[%s779_s1 + $0xd0] sm:$0xff] }
   0x4   :  { %433 = vmatprep.subr.mxu0 %v75_v2  ;;  %v57_v9 = vld [vmem:[%s779_s1 + $0x60] sm:$0xff]  ;;  %v56_v12 = vld [vmem:[%s779_s1 + $0x58] sm:$0xff]  ;;  %v82_v14 = vld [vmem:[%s779_s1 + $0x128] sm:$0xf]  ;;  %v30_v17 = vsub.s32 1, %v609_v10  ;;  %v26_v18 = vsub.s32 0, %v609_v10 }
   0x5   :  { %434 = vmatpush3.msra.mxu0 %v59_v3  ;;  %v55_v15 = vld [vmem:[%s779_s1 + $0x50] sm:$0xff]  ;;  %484 = vmatpush3.msk.msra.mxu1 %vm87_vm1, %v82_v14  ;;  %v81_v16 = vld [vmem:[%s779_s1 + $0x120] sm:$0xff]  ;;  %v34_v19 = vsub.s32 2, %v609_v10  ;;  %v70_v20 = vld [vmem:[%s779_s1 + $0xc8] sm:$0xff] }
   0x6   :  { %435 = vmatprep.subr.mxu0 %v74_v6  ;;  %485 = vmatprep.subr.mxu1 %v548_v4  ;;  %v80_v21 = vld [vmem:[%s779_s1 + $0x118] sm:$0xff]  ;;  %v54_v22 = vld [vmem:[%s779_s1 + $0x48] sm:$0xff]  ;;  %v69_v23 = vld [vmem:[%s779_s1 + $0xc0] sm:$0xff] }
   0x7   :  { %436 = vmatpush3.msra.mxu0 %v58_v7  ;;  %486 = vmatpush3.msra.mxu1 %v81_v16  ;;  %v79_v24 = vld [vmem:[%s779_s1 + $0x110] sm:$0xff]  ;;  %v21_v25 = vld [vmem:[%s780_s2] sm:$0x7] }
   0x8   :  { %437 = vmatprep.subr.mxu0 %v73_v8  ;;  %487 = vmatprep.subr.mxu1 %v548_v4  ;;  %v53_v26 = vld [vmem:[%s779_s1 + $0x40] sm:$0xff]  ;;  %v31_v27 = vrot.slane %v21_v25, %v30_v17  ;;  %v656_v28 = vrot.slane %v21_v25, %v26_v18  ;;  %v35_v29 = vrot.slane %v21_v25, %v34_v19 }
   0x9   :  { %438 = vmatpush3.msra.mxu0 %v57_v9  ;;  %488 = vmatpush3.msra.mxu1 %v80_v21 }
   0xa   :  { %439 = vmatprep.subr.mxu0 %v72_v11 }
   0xb   :  { %440 = vmatpush3.msra.mxu0 %v56_v12 }
   0xc   :  { %441 = vmatprep.subr.mxu0 %v71_v13 }
   0xd   :  { %442 = vmatpush3.msra.mxu0 %v55_v15 }
   0xe   :  { %443 = vmatprep.subr.mxu0 %v70_v20 }
   0xf   :  { %10 = vsyncpa [#allocation3], 0  ;;  %444 = vmatpush3.msra.mxu0 %v54_v22  ;;  %v68_v30 = vld [vmem:[%s779_s1 + $0xb8] sm:$0xff]  ;;  %489 = vmatprep.subr.mxu1 %v548_v4  ;;  %vm234_vm2 = vcmask 355328   ;;  %vm37_vm3 = vcmp.eq.s32.totalorder %v609_v10, %v31_v27  ;;  %v78_v32 = vld [vmem:[%s779_s1 + $0x108] sm:$0xff]  ;;  %vm36_vm4 = vcmp.eq.s32.totalorder %v609_v10, %v656_v28  ;;  %vm38_vm5 = vcmp.eq.s32.totalorder %v609_v10, %v35_v29  ;;  %s551_s12 = smov [#allocation2]  }
  0x10   :  { %445 = vmatprep.subr.mxu0 %v69_v23  ;;  %v52_v31 = vld [vmem:[%s779_s1 + $0x38] sm:$0xff]  ;;  %490 = vmatpush3.msra.mxu1 %v79_v24  ;;  %v67_v33 = vld [vmem:[%s779_s1 + $0xb0] sm:$0xff]  ;;  %v422_v34 = vsel %vm37_vm3, 1.0, %v548_v4  ;;  %v423_v35 = vsel %vm38_vm5, 1.0, %v548_v4  ;;  %v421_v36 = vsel %vm36_vm4, 1.0, %v548_v4  ;;  %v550_v38 = vmov 1.0  }
  0x11   :  { %446 = vmatpush3.msra.mxu0 %v53_v26  ;;  %491 = vmatprep.subr.mxu1 %v548_v4  ;;  %v51_v37 = vld [vmem:[%s779_s1 + $0x30] sm:$0xff]  ;;  %v232_v39 = vsel %vm87_vm1, %v422_v34, 0.0  ;;  %v77_v40 = vld [vmem:[%s779_s1 + $0x100] sm:$0xff]  ;;  %v231_v41 = vsel %vm87_vm1, %v421_v36, 0.0  ;;  %v235_v42 = vsel %vm234_vm2, %v423_v35, 0.0  ;;  %v66_v43 = vld [vmem:[%s779_s1 + $0xa8] sm:$0xff] }
  0x12   :  { %447 = vmatprep.subr.mxu0 %v68_v30  ;;  %424 = vmatprep.mubr.msk.f32.mxu0 %vm37_vm3, %v550_v38  ;;  %vm83_vm6 = vcmask 359424   ;;  %v233_v44 = vadd.f32 %v232_v39, %v231_v41  ;;  %v50_v45 = vld [vmem:[%s779_s1 + $0x28] sm:$0xff]  ;;  %v65_v46 = vld [vmem:[%s779_s1 + $0xa0] sm:$0xff]  ;;  %v64_v49 = vld [vmem:[%s779_s1 + $0x98] sm:$0xff]  ;;  %vm251_vm7 = vcmask 261120   ;;  %s413_s13 = sshll.u32 %s551_s12, 4  ;;  %s414_s13 = int_to_ptr.vmem [resolvable:$true] %s413_s13 }
  0x13   :  { %448 = vmatpush3.msra.mxu0 %v52_v31  ;;  %492 = vmatpush3.msra.mxu1 %v78_v32  ;;  %v49_v48 = vld [vmem:[%s779_s1 + $0x20] sm:$0xff]  ;;  %v48_v50 = vld [vmem:[%s779_s1 + $0x18] sm:$0xff]  ;;  %v63_v51 = vld [vmem:[%s779_s1 + $0x90] sm:$0xff]  ;;  %p531_p1 = scmp.lt.s32.totalorder %s414_s13, %s414_s13 }
  0x14   :  { %449 = vmatprep.subr.mxu0 %v67_v33  ;;  %493 = vmatprep.subr.mxu1 %v548_v4  ;;  %v236_v47 = vadd.f32 %v235_v42, %v233_v44  ;;  %v47_v52 = vld [vmem:[%s779_s1 + $0x10] sm:$0xff]  ;;  %v62_v53 = vld [vmem:[%s779_s1 + $0x88] sm:$0xff]  ;;  %v61_v55 = vld [vmem:[%s779_s1 + $0x80] sm:$0xff] }
  0x15   :  { %450 = vmatpush3.msra.mxu0 %v51_v37  ;;  %494 = vmatpush3.msra.mxu1 %v77_v40  ;;  %v46_v54 = vld [vmem:[%s779_s1 + $0x8] sm:$0xff]  ;;  %v45_v56 = vld [vmem:[%s779_s1] sm:$0xff]  ;;  %v250_v57 = vld [vmem:[%s781_s3 + $0x38] sm:$0xff] }
  0x16   :  { %451 = vmatprep.subr.mxu0 %v66_v43  ;;  %496 = vmatmul.mubr.msk.f32.vlgmr.msra.gmra.mxu1 %vm83_vm6, %v423_v35  ;;  %v249_v58 = vld [vmem:[%s781_s3 + $0x30] sm:$0xff]  ;;  %v248_v59 = vld [vmem:[%s781_s3 + $0x28] sm:$0xff]  ;;  %v247_v60 = vld [vmem:[%s781_s3 + $0x20] sm:$0xff] }
  0x17   :  { %452 = vmatpush3.msra.mxu0 %v50_v45  ;;  %237 = vadd.xlane.f32.xlu0 %v236_v47  ;;  %v246_v8 = vld [vmem:[%s781_s3 + $0x18] sm:$0xff]  ;;  %v245_v9 = vld [vmem:[%s781_s3 + $0x10] sm:$0xff]  ;;  %v244_v10 = vld [vmem:[%s781_s3 + $0x8] sm:$0xff] }
  0x18   :  { %453 = vmatprep.subr.mxu0 %v65_v46  ;;  %498 = vmatprep.subr.mxu1 %v548_v4  ;;  %v243_v11 = vld [vmem:[%s781_s3] sm:$0xff] }
  0x19   :  { %454 = vmatpush3.msra.mxu0 %v49_v48  ;;  %506 = vmatprep.mubr.msk.f32.mxu1 %vm549_vm0, %v548_v4  ;;  %v242_v12 = vld [vmem:[%s778_s0] sm:$0xf]  ;;  %s526_s0 = scalar_lea.vmem %s414_s13, 64 }
  0x1a   :  { %455 = vmatprep.subr.mxu0 %v64_v49  ;;  %499 = vmatpush3.msra.mxu1 %v250_v57  ;;  %v430_v16 = vld [vmem:[%s782_s4] ss:$0 sm:$0xff]  ;;  %p527_p0 = scmp.ne.s32.totalorder %s414_s13, %s526_s0  ;;  %p532_p2 = scmp.lt.s32.totalorder %s526_s0, %s526_s0 }
  0x1b   :  { %456 = vmatpush3.msra.mxu0 %v48_v50  ;;  %500 = vmatprep.subr.mxu1 %v548_v4 }
  0x1c   :  { %457 = vmatprep.subr.mxu0 %v63_v51  ;;  %501 = vmatpush3.msra.mxu1 %v249_v58  ;;  %p533_p3 = por %p532_p2, %p531_p1 }
  0x1d   :  { %458 = vmatpush3.msra.mxu0 %v47_v52  ;;  %502 = vmatprep.subr.mxu1 %v548_v4 }
  0x1e   :  { %459 = vmatprep.subr.mxu0 %v62_v53  ;;  %503 = vmatpush3.msra.mxu1 %v248_v59  ;;  %p534_p4 = pnand %p533_p3, %p527_p0 }
  0x1f   :  { %460 = vmatpush3.msra.mxu0 %v46_v54  ;;  %504 = vmatprep.subr.mxu1 %v548_v4 }
  0x20   :  { %461 = vmatprep.subr.mxu0 %v61_v55  ;;  %505 = vmatpush3.msra.mxu1 %v247_v60 }
  0x21   :  { %462 = vmatpush3.msra.mxu0 %v45_v56  ;;  %509 = vmatprep.subr.mxu1 %v548_v4 }
  0x22   :  { %425 = vmatmul.mubr.msk.f32.vlgmr.msra.gmra.mxu0 %vm36_vm4, %v550_v38 }
  0xa0   :  { %v238_v61 = vpop.xlane.xlu0 %237 }
  0xa1   :  { %v239_v62 = vmax.f32 %v238_v61, 1.0 }
  0xa3   :  { %524 = vrcp.f32 %v239_v62 }
  0xb0   :  { %v525_v5 = vpop.eup %524 }
  0xd6   :  { %v227_v63 = vpop.f32.mrf.mxu1 }
  0xd8   :  { %v497_v0 = vpop.f32.mrf.mxu1 }
  0xe2   :  { %v463_v1 = vpop.f32.mrf.mxu0 }
  0xe4   :  { %v464_v2 = vpop.f32.mrf.mxu0 }
  0xe5   :  { %v465_v3 = vadd.f32 %v464_v2, %v463_v1 }
  0xe7   :  { %v228_v6 = vadd.f32 %v465_v3, %v227_v63 }
  0xe9   :  { %v241_v7 = vmul.f32 %v525_v5, %v228_v6 }
  0xeb   :  { %507 = vmatmul.mubr.msk.f32.vlgmr.msra.gmra.mxu1 %vm251_vm7, %v241_v7 }
  0xec   :  { %510 = vmatpush3.msra.mxu1 %v246_v8  ;;  %517 = vmatprep.mubr.msk.f32.mxu1 %vm549_vm0, %v548_v4 }
  0xed   :  { %511 = vmatprep.subr.mxu1 %v548_v4 }
  0xee   :  { %512 = vmatpush3.msra.mxu1 %v245_v9 }
  0xef   :  { %513 = vmatprep.subr.mxu1 %v548_v4 }
  0xf0   :  { %514 = vmatpush3.msra.mxu1 %v244_v10 }
  0xf1   :  { %515 = vmatprep.subr.mxu1 %v548_v4 }
  0xf2   :  { %516 = vmatpush3.msra.mxu1 %v243_v11 }
  0xf3   :  { %518 = vmatmul.mubr.msk.f32.vlgmr.msra.gmra.mxu1 %vm251_vm7, %v242_v12 }
 0x1ab   :  { %v321_v13 = vpop.f32.mrf.mxu1 }
 0x1ad   :  { %v508_v14 = vpop.f32.mrf.mxu1 }
 0x1b3   :  { %v394_v15 = vpop.f32.mrf.mxu1 }
 0x1b4   :  { %v395_v17 = vadd.f32 %v394_v15, %v321_v13 }
 0x1b5   :  { %v519_v18 = vpop.f32.mrf.mxu1 }
 0x1b6   :  { %v405_v19 = vadd.f32 %v430_v16, %v395_v17 }
 0x1b8   :  { %406 = vst [vmem:[#allocation2] sm:$0xf] %v405_v19 }
 0x1b9   :  { %537 = shalt.err (!%p534_p4)
}
 0x1ba   :  { %416 = dma.vmem_to_hbm [thread:$0]  %s414_s13, 64, %s783_s5, [#allocation3]  }
 0x1bb   :  { %546 = dma.done.wait [#allocation3], 64  }
 0x1bc   :  { %547 = vsyncadd [#allocation3], 4294967232 }
 0x1bd   :  { %420 = vsyncpa [#allocation3], 1 }

</bundles_post_ra>
